<compile_context>
chip_gen: v7x
topology: tpu7x:2x2x1
jax: 0.10.0
libtpu: 0.0.40
codegen_flags: <defaults>
</compile_context>

<pallas_src>
import functools

import jax
import jax.numpy as jnp
from jax import lax
from jax.experimental import pallas as pl
from jax.experimental.pallas import tpu as pltpu

_EPS = 1e-8  # matches torch cosine-similarity eps clamp


def _cosine_loss_kernel(x_ref, y_ref, o_ref, acc_ref, *,
                        batch, block_rows, tiles_per_seg,
                        needs_mask, first_masked_tile):
    seg = pl.program_id(0)   # segment (TensorCore) axis, "parallel"
    i = pl.program_id(1)     # batch-tile streaming axis, "arbitrary" (reduction)
    tile_idx = seg * tiles_per_seg + i

    @pl.when(i == 0)
    def _init():
        acc_ref[...] = jnp.zeros_like(acc_ref)

    x = x_ref[...].astype(jnp.float32)   # (TB, D)
    y = y_ref[...].astype(jnp.float32)

    sxy = jnp.sum(x * y, axis=-1, keepdims=True)   # (TB, 1)
    sxx = jnp.sum(x * x, axis=-1, keepdims=True)
    syy = jnp.sum(y * y, axis=-1, keepdims=True)

    # torch: cos = <x,y> / (max(||x||, eps) * max(||y||, eps)); clamp each norm
    # separately.  rsqrt runs on the EUP slot (free in this HBM-bound kernel).
    inv_nx = lax.rsqrt(jnp.maximum(sxx, _EPS * _EPS))
    inv_ny = lax.rsqrt(jnp.maximum(syy, _EPS * _EPS))
    per_row = 1.0 - sxy * inv_nx * inv_ny          # (TB, 1)

    if needs_mask:
        # Only tiles at/after the batch boundary (tail tile + clamped overflow
        # tiles) pay for the iota/compare/where mask.
        @pl.when(tile_idx < first_masked_tile)
        def _interior():
            acc_ref[...] += per_row

        @pl.when(tile_idx >= first_masked_tile)
        def _boundary():
            row = lax.broadcasted_iota(jnp.int32, (block_rows, 1), 0)
            global_row = tile_idx * block_rows + row
            acc_ref[...] += jnp.where(global_row < batch, per_row, 0.0)
    else:
        acc_ref[...] += per_row

    @pl.when(i == tiles_per_seg - 1)
    def _finalize():
        # Sublane reduction once per segment; lane-dense unmasked single store.
        total = jnp.sum(acc_ref[...], keepdims=True)           # (1, 1)
        o_ref[...] = jnp.broadcast_to(total, o_ref.shape)      # (1, 8, 128)


def _bytes_per_row(feat: int, itemsize: int) -> int:
    # 2 inputs x 2 pipeline buffers in the input dtype, ~3 tile-sized f32
    # temporaries (x/y casts + one live product), plus a few lane-padded (TB, 1)
    # f32 per-row vectors (sums, cos, accumulator).
    return 4 * feat * itemsize + 3 * feat * 4 + 3072


def _choose_block_rows(batch: int, feat: int, itemsize: int,
                       vmem_budget_bytes: int) -> int:
    rows = vmem_budget_bytes // max(_bytes_per_row(feat, itemsize), 1)
    if rows >= batch:
        return batch   # single full-batch tile; full-dim blocks need no alignment
    sublane = max(8, 32 // max(itemsize, 1))   # 8 f32, 16 bf16, 32 int8/fp8
    return int(max(sublane, (rows // sublane) * sublane))


def _default_num_segments() -> int:
    # Split the streaming work across TensorCores only on multi-core chips (v7x);
    # on single-TC v5e/v6e the extra axis is pure overhead, so default to 1.
    try:
        info = pltpu.get_tpu_info()
    except Exception:
        return 1
    for attr in ("num_cores", "core_count", "num_tensorcores",
                 "tensorcore_count", "cores_per_chip"):
        n = getattr(info, attr, None)
        if isinstance(n, int) and n > 0:
            return min(n, 2)
    return 1


def cosine_loss(image_features: jax.Array, combined_features: jax.Array,
                margin: float = 0.1, *, block_rows: int | None = None,
                num_segments: int | None = None,
                vmem_budget_bytes: int = 28 << 20) -> jax.Array:
    """Pallas equivalent of CosineLoss.forward (target = all ones). Scalar f32."""
    assert image_features.shape == combined_features.shape
    assert image_features.ndim == 2
    del margin  # only affects target == -1 pairs; target is all +1 here

    batch, feat = image_features.shape
    itemsize = jnp.dtype(image_features.dtype).itemsize

    if block_rows is None:
        block_rows = _choose_block_rows(batch, feat, itemsize, vmem_budget_bytes)
    block_rows = int(block_rows)

    n_tiles = int(pl.cdiv(batch, block_rows))
    if num_segments is None:
        num_segments = _default_num_segments()
    num_segments = max(1, min(int(num_segments), n_tiles))
    tiles_per_seg = int(pl.cdiv(n_tiles, num_segments))

    has_tail = (batch % block_rows) != 0
    has_overflow = num_segments * tiles_per_seg > n_tiles
    needs_mask = has_tail or has_overflow
    first_masked_tile = n_tiles - 1 if has_tail else n_tiles

    last_block = n_tiles - 1
    if has_overflow:
        # Clamp so padded overflow steps never issue an out-of-bounds DMA; their
        # rows are fully masked inside the kernel.
        def in_map(s, i):
            return (jnp.minimum(s * tiles_per_seg + i, last_block), 0)
    else:
        def in_map(s, i):
            return (s * tiles_per_seg + i, 0)

    # Explicit scoped-VMEM limit that matches the tiling heuristic (covers the
    # pipeline buffers + f32 working set + headroom); <= 48 MiB so it is safe on
    # v7x's 64 MiB physical per-TC VMEM and v5e/v6e's 128 MiB.
    est_vmem = block_rows * _bytes_per_row(feat, itemsize)
    vmem_limit_bytes = int(min(48 << 20, max(32 << 20, est_vmem + (8 << 20))))

    kernel = functools.partial(
        _cosine_loss_kernel,
        batch=batch, block_rows=block_rows, tiles_per_seg=tiles_per_seg,
        needs_mask=needs_mask, first_masked_tile=first_masked_tile)

    partials = pl.pallas_call(
        kernel,
        out_shape=jax.ShapeDtypeStruct((num_segments, 8, 128), jnp.float32),
        grid_spec=pltpu.PrefetchScalarGridSpec(
            num_scalar_prefetch=0,
            grid=(num_segments, tiles_per_seg),
            in_specs=[
                pl.BlockSpec((block_rows, feat), in_map),
                pl.BlockSpec((block_rows, feat), in_map),
            ],
            out_specs=pl.BlockSpec((1, 8, 128), lambda s, i: (s, 0, 0)),
            scratch_shapes=[pltpu.VMEM((block_rows, 1), jnp.float32)],
        ),
        compiler_params=pltpu.CompilerParams(
            dimension_semantics=("parallel", "arbitrary"),
            vmem_limit_bytes=vmem_limit_bytes),
    )(image_features, combined_features)

    # Each segment's block holds its partial sum; read one lane per segment.
    return jnp.sum(partials[:, 0, 0]) / batch


def _reference(x: jax.Array, y: jax.Array) -> jax.Array:
    dot = jnp.sum(x * y, axis=-1)
    nx = jnp.maximum(jnp.sqrt(jnp.sum(x * x, axis=-1)), _EPS)
    ny = jnp.maximum(jnp.sqrt(jnp.sum(y * y, axis=-1)), _EPS)
    return jnp.mean(1.0 - dot / (nx * ny))


if __name__ == "__main__":
    key = jax.random.PRNGKey(0)
    k1, k2 = jax.random.split(key)

    B, D = 20, 256   # deliberately not a multiple of the 8-row sublane tile
    image_features = jax.random.normal(k1, (B, D), dtype=jnp.float32)
    combined_features = jax.random.normal(k2, (B, D), dtype=jnp.float32)

    ref = _reference(image_features, combined_features)

    # Auto-sized tiles (whole batch fits one tile -> single step, no masking).
    loss = cosine_loss(image_features, combined_features, margin=0.1)
    jax.block_until_ready(loss)
    assert jnp.allclose(loss, ref, atol=1e-5, rtol=1e-5), (loss, ref)

    # Small tiles + forced 2-way segment split: exercises multi-tile streaming,
    # the gated tail mask, and the clamped overflow step.
    loss_tiled = cosine_loss(image_features, combined_features, margin=0.1,
                             block_rows=8, num_segments=2)
    jax.block_until_ready(loss_tiled)
    assert jnp.allclose(loss_tiled, ref, atol=1e-5, rtol=1e-5), (loss_tiled, ref)

    # bf16 inputs stream at half the HBM bytes; all math stays f32 in-kernel.
    xb = image_features.astype(jnp.bfloat16)
    yb = combined_features.astype(jnp.bfloat16)
    ref_b = _reference(xb.astype(jnp.float32), yb.astype(jnp.float32))
    loss_b = cosine_loss(xb, yb, margin=0.1)
    jax.block_until_ready(loss_b)
    assert jnp.allclose(loss_b, ref_b, atol=5e-3, rtol=5e-3), (loss_b, ref_b)

    print("KERNEL_OK")
</pallas_src>

<mosaic_0001>
module attributes {stable_mosaic.version = 11 : i64} {
  func.func @_cosine_loss_kernel(%arg0: i32, %arg1: i32, %arg2: memref<20x256xf32, #tpu.memory_space<vmem>>, %arg3: memref<20x256xf32, #tpu.memory_space<vmem>>, %arg4: memref<1x8x128xf32, #tpu.memory_space<vmem>>, %arg5: memref<20x1xf32, #tpu.memory_space<vmem>>) attributes {dimension_semantics = [#tpu.dimension_semantics<parallel>, #tpu.dimension_semantics<arbitrary>], iteration_bounds = array<i64: 1, 1>, scalar_prefetch = 0 : i64, scratch_operands = 1 : i64, tpu.core_type = #tpu.core_type<tc>, window_params = [{transform_indices = @transform_0, window_bounds = array<i64: 20, 256>}, {transform_indices = @transform_1, window_bounds = array<i64: 20, 256>}, {transform_indices = @transform_2, window_bounds = array<i64: 1, 8, 128>}]} {
    %c0_i32 = arith.constant 0 : i32
    %0 = arith.cmpi eq, %arg1, %c0_i32 : i32
    %1 = arith.extui %0 : i1 to i32
    %c0_i32_0 = arith.constant 0 : i32
    %2 = arith.cmpi ne, %1, %c0_i32_0 : i32
    scf.if %2 {
      %cst_15 = arith.constant 0.000000e+00 : f32
      %30 = vector.broadcast %cst_15 : f32 to vector<20x1xf32>
      %c0_16 = arith.constant 0 : index
      %c0_17 = arith.constant 0 : index
      %31 = vector.load %arg5[%c0_16, %c0_17] : memref<20x1xf32, #tpu.memory_space<vmem>>, vector<20x1xf32>
      tpu.vector_store %arg5[%c0_16, %c0_17], %30 {strides = array<i32>} : memref<20x1xf32, #tpu.memory_space<vmem>>, vector<20x1xf32>,
    } else {
    }
    %c0 = arith.constant 0 : index
    %c0_1 = arith.constant 0 : index
    %3 = vector.load %arg2[%c0, %c0_1] : memref<20x256xf32, #tpu.memory_space<vmem>>, vector<20x256xf32>
    %c0_2 = arith.constant 0 : index
    %c0_3 = arith.constant 0 : index
    %4 = vector.load %arg3[%c0_2, %c0_3] : memref<20x256xf32, #tpu.memory_space<vmem>>, vector<20x256xf32>
    %5 = arith.mulf %3, %4 : vector<20x256xf32>
    %cst = arith.constant dense<0.000000e+00> : vector<20xf32>
    %6 = vector.multi_reduction <add>, %5, %cst [1] : vector<20x256xf32> to vector<20xf32>
    %7 = vector.shape_cast %6 : vector<20xf32> to vector<20x1xf32>
    %8 = arith.mulf %3, %3 : vector<20x256xf32>
    %cst_4 = arith.constant dense<0.000000e+00> : vector<20xf32>
    %9 = vector.multi_reduction <add>, %8, %cst_4 [1] : vector<20x256xf32> to vector<20xf32>
    %10 = vector.shape_cast %9 : vector<20xf32> to vector<20x1xf32>
    %11 = arith.mulf %4, %4 : vector<20x256xf32>
    %cst_5 = arith.constant dense<0.000000e+00> : vector<20xf32>
    %12 = vector.multi_reduction <add>, %11, %cst_5 [1] : vector<20x256xf32> to vector<20xf32>
    %13 = vector.shape_cast %12 : vector<20xf32> to vector<20x1xf32>
    %cst_6 = arith.constant 1.000000e-16 : f32
    %14 = vector.broadcast %cst_6 : f32 to vector<20x1xf32>
    %15 = arith.maximumf %10, %14 : vector<20x1xf32>
    %16 = math.rsqrt %15 : vector<20x1xf32>
    %cst_7 = arith.constant 1.000000e-16 : f32
    %17 = vector.broadcast %cst_7 : f32 to vector<20x1xf32>
    %18 = arith.maximumf %13, %17 : vector<20x1xf32>
    %19 = math.rsqrt %18 : vector<20x1xf32>
    %20 = arith.mulf %7, %16 : vector<20x1xf32>
    %21 = arith.mulf %20, %19 : vector<20x1xf32>
    %cst_8 = arith.constant 1.000000e+00 : f32
    %22 = vector.broadcast %cst_8 : f32 to vector<20x1xf32>
    %23 = arith.subf %22, %21 : vector<20x1xf32>
    %c0_9 = arith.constant 0 : index
    %c0_10 = arith.constant 0 : index
    %24 = vector.load %arg5[%c0_9, %c0_10] : memref<20x1xf32, #tpu.memory_space<vmem>>, vector<20x1xf32>
    %25 = arith.addf %24, %23 : vector<20x1xf32>
    %c0_11 = arith.constant 0 : index
    %c0_12 = arith.constant 0 : index
    %26 = vector.load %arg5[%c0_11, %c0_12] : memref<20x1xf32, #tpu.memory_space<vmem>>, vector<20x1xf32>
    tpu.vector_store %arg5[%c0_11, %c0_12], %25 {strides = array<i32>} : memref<20x1xf32, #tpu.memory_space<vmem>>, vector<20x1xf32>,
    %c0_i32_13 = arith.constant 0 : i32
    %27 = arith.cmpi eq, %arg1, %c0_i32_13 : i32
    %28 = arith.extui %27 : i1 to i32
    %c0_i32_14 = arith.constant 0 : i32
    %29 = arith.cmpi ne, %28, %c0_i32_14 : i32
    scf.if %29 {
      %c0_15 = arith.constant 0 : index
      %c0_16 = arith.constant 0 : index
      %30 = vector.load %arg5[%c0_15, %c0_16] : memref<20x1xf32, #tpu.memory_space<vmem>>, vector<20x1xf32>
      %31 = vector.shape_cast %30 : vector<20x1xf32> to vector<1x20x1xf32>
      %cst_17 = arith.constant dense<0.000000e+00> : vector<1xf32>
      %32 = vector.multi_reduction <add>, %31, %cst_17 [1, 2] : vector<1x20x1xf32> to vector<1xf32>
      %33 = vector.shape_cast %32 : vector<1xf32> to vector<1x1x1xf32>
      %34 = vector.extract %33[0, 0, 0] : f32 from vector<1x1x1xf32>
      %35 = vector.broadcast %34 : f32 to vector<1x1xf32>
      %36 = vector.shape_cast %35 : vector<1x1xf32> to vector<1x1x1xf32>
      %37 = vector.broadcast %36 : vector<1x1x1xf32> to vector<1x8x128xf32>
      %c0_18 = arith.constant 0 : index
      %c0_19 = arith.constant 0 : index
      %c0_20 = arith.constant 0 : index
      %38 = vector.load %arg4[%c0_18, %c0_19, %c0_20] : memref<1x8x128xf32, #tpu.memory_space<vmem>>, vector<1x8x128xf32>
      tpu.vector_store %arg4[%c0_18, %c0_19, %c0_20], %37 {strides = array<i32>} : memref<1x8x128xf32, #tpu.memory_space<vmem>>, vector<1x8x128xf32>,
    } else {
    }
    return
  }
  func.func @transform_0(%arg0: i32, %arg1: i32) -> (i32, i32) {
    %c1_i32 = arith.constant 1 : i32
    %0 = arith.muli %arg0, %c1_i32 : i32
    %1 = arith.addi %0, %arg1 : i32
    %c0_i32 = arith.constant 0 : i32
    %c0_i32_0 = arith.constant 0 : i32
    return %1, %c0_i32 : i32, i32
  }
  func.func @transform_1(%arg0: i32, %arg1: i32) -> (i32, i32) {
    %c1_i32 = arith.constant 1 : i32
    %0 = arith.muli %arg0, %c1_i32 : i32
    %1 = arith.addi %0, %arg1 : i32
    %c0_i32 = arith.constant 0 : i32
    %c0_i32_0 = arith.constant 0 : i32
    return %1, %c0_i32 : i32, i32
  }
  func.func @transform_2(%arg0: i32, %arg1: i32) -> (i32, i32, i32) {
    %c0_i32 = arith.constant 0 : i32
    %c0_i32_0 = arith.constant 0 : i32
    %c0_i32_1 = arith.constant 0 : i32
    return %arg0, %c0_i32, %c0_i32_0 : i32, i32, i32
  }
}

</mosaic_0001>

<bundles_post_ra>
// kernel: tpu_custom_call.1
= control target key start
LH: loop header
LB: loop body
LE: loop exit
PB: predicated region body
PF: predicated region fallthrough
CT: control target
= control target key end

     0   :  { %7 = vsyncpa [#allocation4], 0  ;;  %s361_s0 = inlined_call_operand.hbm [shape: f32[20,256], index: 0, kind: input, shape index: {}]   ;;  %s362_s1 = inlined_call_operand.hbm [shape: f32[20,256], index: 1, kind: input, shape index: {}]   ;;  %s363_s2 = inlined_call_operand.hbm [shape: f32[1,8,128], index: 2, kind: output, shape index: {}]  }
   0x1   :  { %8 = vsyncpa [#allocation7], 0 }
   0x2   :  { %9 = vsyncpa [#allocation5], 0  ;;  %s289_s9 = smov [#allocation3]   ;;  %s217_s13 = scalar_lea.hbm %s361_s0, 768 }
   0x3   :  { %s20_s10 = sshll.u32 %s289_s9, 4  ;;  %p218_p0 = scmp.ne.s32.totalorder %s361_s0, %s217_s13  ;;  %s21_s10 = int_to_ptr.vmem [resolvable:$true] %s20_s10 }
   0x4   :  { %p221_p1 = scmp.lt.u32.totalorder %s217_s13, %s361_s0 }
   0x6   :  { %p223_p2 = pnand %p221_p1, %p218_p0 }
   0x8   :  { %226 = shalt.err (!%p223_p2)
}
   0x9   :  { %s227_s18 = scalar_lea.vmem %s21_s10, 768  ;;  %p232_p4 = scmp.lt.s32.totalorder %s21_s10, %s21_s10 }
   0xa   :  { %p228_p3 = scmp.ne.s32.totalorder %s21_s10, %s227_s18  ;;  %p233_p5 = scmp.lt.s32.totalorder %s227_s18, %s227_s18 }
   0xc   :  { %p234_p6 = por %p233_p5, %p232_p4 }
   0xe   :  { %p235_p7 = pnand %p234_p6, %p228_p3 }
  0x10   :  { %238 = shalt.err (!%p235_p7)
}
  0x11   :  { %s290_s19 = smov 256   ;;  %s291_s20 = smov 16  }
  0x12   :  { %26 = dma.hbm_to_vmem [thread:$0]  %s361_s0, 768, %s21_s10, [#allocation4], %s290_s19, %s290_s19, %s291_s20  }
  0x13   :  { %s292_s23 = smov [#allocation6]   ;;  %s239_s27 = scalar_lea.hbm %s362_s1, 768 }
  0x14   :  { %s37_s24 = sshll.u32 %s292_s23, 4  ;;  %p240_p8 = scmp.ne.s32.totalorder %s362_s1, %s239_s27  ;;  %s38_s24 = int_to_ptr.vmem [resolvable:$true] %s37_s24 }
  0x15   :  { %p243_p9 = scmp.lt.u32.totalorder %s239_s27, %s362_s1 }
  0x17   :  { %p245_p10 = pnand %p243_p9, %p240_p8 }
  0x19   :  { %248 = shalt.err (!%p245_p10)
}
  0x1a   :  { %s249_s4 = scalar_lea.vmem %s38_s24, 768  ;;  %p254_p12 = scmp.lt.s32.totalorder %s38_s24, %s38_s24 }
  0x1b   :  { %p250_p11 = scmp.ne.s32.totalorder %s38_s24, %s249_s4  ;;  %p255_p13 = scmp.lt.s32.totalorder %s249_s4, %s249_s4 }
  0x1d   :  { %p256_p0 = por %p255_p13, %p254_p12 }
  0x1f   :  { %p257_p1 = pnand %p256_p0, %p250_p11 }
  0x21   :  { %260 = shalt.err (!%p257_p1)
}
  0x22   :  { %43 = dma.hbm_to_vmem [thread:$0]  %s362_s1, 768, %s38_s24, [#allocation7], %s290_s19, %s290_s19, %s291_s20  }
  0x23   :  { %283 = dma.done.wait [#allocation4], 768  }
  0x24   :  { %284 = vsyncadd [#allocation4], 4294966528 }
  0x25   :  { %285 = dma.done.wait [#allocation7], 768  }
  0x26   :  { %286 = vsyncadd [#allocation7], 4294966528  ;;  %v69_v0 = vld [vmem:[#allocation6] sm:$0xff]  ;;  %v70_v1 = vld [vmem:[#allocation6 + $0x8] sm:$0xff]  ;;  %vm87_vm0 = vcmask 1043456   ;;  %vm58_vm1 = vcmask 7168  }
  0x27   :  { %v63_v2 = vld [vmem:[#allocation3] sm:$0xff]  ;;  %v110_v3 = vmul.f32 %v69_v0, %v69_v0  ;;  %v111_v4 = vmul.f32 %v70_v1, %v70_v1  ;;  %v64_v5 = vld [vmem:[#allocation3 + $0x8] sm:$0xff]  ;;  %v65_v12 = vld [vmem:[#allocation3 + $0x10] sm:$0xff]  ;;  %v293_v45 = vmov 0.0   ;;  %vm61_vm2 = vcmask 3072   ;;  %s294_s1 = smov [#allocation8]  }
  0x28   :  { %v93_v6 = vmul.f32 %v63_v2, %v63_v2  ;;  %v67_v7 = vld [vmem:[#allocation3 + $0x20] sm:$0xf]  ;;  %v68_v8 = vld [vmem:[#allocation3 + $0x28] sm:$0xf]  ;;  %v94_v9 = vmul.f32 %v64_v5, %v64_v5  ;;  %v66_v13 = vld [vmem:[#allocation3 + $0x18] sm:$0xff]  ;;  %v95_v16 = vmul.f32 %v65_v12, %v65_v12  ;;  %v75_v36 = vmul.f32 %v69_v0, %v63_v2  ;;  %59 = vst.msk [vmem:[#allocation2] sm:$0xff] %vm58_vm1, %v293_v45 }
  0x29   :  { %v97_v10 = vmul.f32 %v67_v7, %v67_v7  ;;  %v98_v11 = vmul.f32 %v68_v8, %v68_v8  ;;  %v73_v14 = vld [vmem:[#allocation6 + $0x20] sm:$0xf]  ;;  %v116_v15 = vadd.f32 %v111_v4, %v110_v3  ;;  %v96_v17 = vmul.f32 %v66_v13, %v66_v13  ;;  %v74_v18 = vld [vmem:[#allocation6 + $0x28] sm:$0xf]  ;;  %v71_v20 = vld [vmem:[#allocation6 + $0x10] sm:$0xff]  ;;  %60 = vst.msk [vmem:[#allocation2 + $0x8] sm:$0xff] %vm58_vm1, %v293_v45 }
  0x2a   :  { %v114_v19 = vmul.f32 %v73_v14, %v73_v14  ;;  %v72_v21 = vld [vmem:[#allocation6 + $0x18] sm:$0xff]  ;;  %v99_v22 = vadd.f32 %v94_v9, %v93_v6  ;;  %v115_v25 = vmul.f32 %v74_v18, %v74_v18  ;;  %v112_v30 = vmul.f32 %v71_v20, %v71_v20  ;;  %62 = vst.msk [vmem:[#allocation2 + $0x10] sm:$0xf] %vm61_vm2, %v293_v45  ;;  %s187_s6 = sshll.u32 %s294_s1, 4  ;;  %s188_s6 = int_to_ptr.vmem [resolvable:$true] %s187_s6 }
  0x2b   :  { %v105_v23 = vsel %vm87_vm0, %v97_v10, 0.0  ;;  %v106_v24 = vsel %vm87_vm0, %v98_v11, 0.0  ;;  %117 = vadd.xlane.f32.xlu1 %v116_v15  ;;  %v102_v27 = vadd.f32 %v96_v17, %v95_v16  ;;  %v113_v31 = vmul.f32 %v72_v21, %v72_v21  ;;  %s261_s8 = scalar_lea.vmem %s188_s6, 128  ;;  %p266_p3 = scmp.lt.s32.totalorder %s188_s6, %s188_s6 }
  0x2c   :  { %v107_v26 = vadd.f32 %v106_v24, %v105_v23  ;;  %100 = vadd.xlane.f32.xlu0 %v99_v22  ;;  %v122_v28 = vsel %vm87_vm0, %v114_v19, 0.0  ;;  %v123_v29 = vsel %vm87_vm0, %v115_v25, 0.0  ;;  %v77_v33 = vmul.f32 %v71_v20, %v65_v12  ;;  %p262_p2 = scmp.ne.s32.totalorder %s188_s6, %s261_s8  ;;  %p267_p4 = scmp.lt.s32.totalorder %s261_s8, %s261_s8 }
  0x2d   :  { %v124_v32 = vadd.f32 %v123_v29, %v122_v28  ;;  %v78_v34 = vmul.f32 %v72_v21, %v66_v13  ;;  %v119_v35 = vadd.f32 %v113_v31, %v112_v30  ;;  %v76_v37 = vmul.f32 %v70_v1, %v64_v5 }
  0x2e   :  { %v79_v38 = vmul.f32 %v73_v14, %v67_v7  ;;  %v80_v39 = vmul.f32 %v74_v18, %v68_v8  ;;  %p268_p5 = por %p267_p4, %p266_p3 }
  0x2f   :  { %108 = vadd.xlane.f32.xlu1 %v107_v26  ;;  %v84_v40 = vadd.f32 %v78_v34, %v77_v33  ;;  %v81_v41 = vadd.f32 %v76_v37, %v75_v36  ;;  %v148_v2 = vld [vmem:[#allocation2] sm:$0xff] }
  0x30   :  { %103 = vadd.xlane.f32.xlu0 %v102_v27  ;;  %v88_v42 = vsel %vm87_vm0, %v79_v38, 0.0  ;;  %v89_v43 = vsel %vm87_vm0, %v80_v39, 0.0  ;;  %v149_v13 = vld [vmem:[#allocation2 + $0x8] sm:$0xff]  ;;  %p269_p6 = pnand %p268_p5, %p262_p2 }
  0x31   :  { %v90_v44 = vadd.f32 %v89_v43, %v88_v42  ;;  %v150_v12 = vld [vmem:[#allocation2 + $0x10] sm:$0xf] }
  0x33   :  { %125 = vadd.xlane.f32.xlu1 %v124_v32 }
  0x34   :  { %120 = vadd.xlane.f32.xlu0 %v119_v35 }
  0x37   :  { %85 = vadd.xlane.f32.xlu1 %v84_v40 }
  0x38   :  { %82 = vadd.xlane.f32.xlu0 %v81_v41 }
  0x3c   :  { %91 = vadd.xlane.f32.xlu0 %v90_v44 }
  0xb8   :  { %v118_v46 = vpop.xlane.xlu1 %117 }
  0xb9   :  { %v133_v47 = vmax.f32 %v118_v46, 1e-16  ;;  %v101_v48 = vpop.xlane.xlu0 %100 }
  0xba   :  { %v127_v49 = vmax.f32 %v101_v48, 1e-16 }
  0xbb   :  { %205 = vrsqrt.f32 %v133_v47 }
  0xbc   :  { %207 = vrsqrt.f32 %v127_v49  ;;  %v109_v50 = vpop.xlane.xlu1 %108 }
  0xbd   :  { %v129_v51 = vmax.f32 %v109_v50, 1e-16  ;;  %v104_v52 = vpop.xlane.xlu0 %103 }
  0xbe   :  { %v128_v53 = vmax.f32 %v104_v52, 1e-16 }
  0xbf   :  { %209 = vrsqrt.f32 %v129_v51 }
  0xc0   :  { %211 = vrsqrt.f32 %v128_v53  ;;  %v126_v54 = vpop.xlane.xlu1 %125 }
  0xc1   :  { %v135_v55 = vmax.f32 %v126_v54, 1e-16  ;;  %v121_v56 = vpop.xlane.xlu0 %120 }
  0xc2   :  { %v134_v57 = vmax.f32 %v121_v56, 1e-16 }
  0xc3   :  { %213 = vrsqrt.f32 %v135_v55 }
  0xc4   :  { %215 = vrsqrt.f32 %v134_v57  ;;  %v86_v3 = vpop.xlane.xlu1 %85 }
  0xc5   :  { %v206_v58 = vpop.eup %205  ;;  %v83_v59 = vpop.xlane.xlu0 %82 }
  0xc6   :  { %v208_v60 = vpop.eup %207 }
  0xc7   :  { %v139_v61 = vmul.f32 %v208_v60, %v83_v59 }
  0xc9   :  { %v210_v62 = vpop.eup %209  ;;  %v142_v63 = vmul.f32 %v206_v58, %v139_v61  ;;  %v92_v0 = vpop.xlane.xlu0 %91 }
  0xca   :  { %v212_v1 = vpop.eup %211  ;;  %v141_v4 = vmul.f32 %v210_v62, %v92_v0 }
  0xcb   :  { %v145_v5 = vsub.f32 1.0, %v142_v63  ;;  %v140_v8 = vmul.f32 %v212_v1, %v86_v3 }
  0xcd   :  { %v214_v6 = vpop.eup %213  ;;  %v151_v7 = vadd.f32 %v148_v2, %v145_v5 }
  0xce   :  { %v216_v9 = vpop.eup %215  ;;  %v144_v10 = vmul.f32 %v214_v6, %v141_v4 }
  0xcf   :  { %155 = vst.msk [vmem:[#allocation2] sm:$0xff] %vm58_vm1, %v151_v7  ;;  %v143_v11 = vmul.f32 %v216_v9, %v140_v8 }
  0xd0   :  { %v147_v14 = vsub.f32 1.0, %v144_v10 }
  0xd1   :  { %v146_v15 = vsub.f32 1.0, %v143_v11 }
  0xd2   :  { %v153_v16 = vadd.f32 %v150_v12, %v147_v14 }
  0xd3   :  { %v152_v17 = vadd.f32 %v149_v13, %v146_v15 }
  0xd4   :  { %158 = vst.msk [vmem:[#allocation2 + $0x10] sm:$0xf] %vm61_vm2, %v153_v16 }
  0xd5   :  { %156 = vst.msk [vmem:[#allocation2 + $0x8] sm:$0xff] %vm58_vm1, %v152_v17 }
  0xd6   :  { %v162_v18 = vld [vmem:[#allocation2] sm:$0xff] }
  0xd7   :  { %v165_v21 = vsel %vm58_vm1, %v162_v18, 0.0 }
  0xdb   :  { %v164_v20 = vld [vmem:[#allocation2 + $0x10] sm:$0xf] }
  0xdc   :  { %v163_v19 = vld [vmem:[#allocation2 + $0x8] sm:$0xff]  ;;  %v168_v24 = vsel %vm61_vm2, %v164_v20, 0.0 }
  0xdd   :  { %v166_v22 = vsel %vm58_vm1, %v163_v19, 0.0 }
  0xde   :  { %v167_v23 = vadd.f32 %v166_v22, %v165_v21 }
  0xe0   :  { %v169_v25 = vadd.f32 %v168_v24, %v167_v23 }
  0xe2   :  { %170 = vadd.xlane.f32.xlu1 %v169_v25 }
 0x16f   :  { %v171_v26 = vpop.xlane.xlu1 %170 }
 0x170   :  { %v172_v27 = vrot.slane %v171_v26, 4 }
 0x172   :  { %v173_v28 = vadd.f32 %v172_v27, %v171_v26 }
 0x174   :  { %v174_v29 = vrot.slane %v173_v28, 2 }
 0x176   :  { %v175_v30 = vadd.f32 %v174_v29, %v173_v28 }
 0x178   :  { %v176_v31 = vrot.slane %v175_v30, 1 }
 0x17a   :  { %v177_v32 = vadd.f32 %v176_v31, %v175_v30 }
 0x17c   :  { %197 = vpush %v177_v32 }
 0x1ad   :  { %s198_s7 = spop %197 }
 0x1ae   :  { %v179_v33 = vstv %s198_s7 }
 0x1af   :  { %180 = vst [vmem:[#allocation8] sm:$0xff] %v179_v33 }
 0x1b0   :  { %272 = shalt.err (!%p269_p6)
}
 0x1b1   :  { %s273_s11 = scalar_lea.hbm %s363_s2, 128 }
 0x1b2   :  { %p274_p7 = scmp.ne.s32.totalorder %s363_s2, %s273_s11  ;;  %p277_p8 = scmp.lt.u32.totalorder %s273_s11, %s363_s2 }
 0x1b4   :  { %p279_p9 = pnand %p277_p8, %p274_p7 }
 0x1b6   :  { %282 = shalt.err (!%p279_p9)
}
 0x1b7   :  { %190 = dma.vmem_to_hbm [thread:$0]  %s188_s6, 128, %s363_s2, [#allocation5]  }
 0x1b8   :  { %287 = dma.done.wait [#allocation5], 128  }
 0x1b9   :  { %288 = vsyncadd [#allocation5], 4294967168 }
 0x1ba   :  { %194 = vsyncpa [#allocation4], 1 }
 0x1bb   :  { %195 = vsyncpa [#allocation7], 1 }
 0x1bc   :  { %196 = vsyncpa [#allocation5], 1 }

</bundles_post_ra>
